<compile_context>
chip_gen: v7x
topology: tpu7x:2x2x1
jax: 0.10.0
libtpu: 0.0.40
codegen_flags: <defaults>
</compile_context>

<pallas_src>
import functools

import jax
import jax.numpy as jnp
from jax.experimental import pallas as pl
from jax.experimental.pallas import tpu as pltpu


def _signature_embed_kernel(x_ref, w1_ref, b1_ref, w2_ref, b2_ref, o_ref,
                            *, compute_dtype):
    # sig.float(): upcast directly from the storage dtype (e.g. int8) to the
    # compute dtype -- exact for small-integer signature counts.
    x = x_ref[...].astype(compute_dtype)

    # fc[0]: Linear(max_cells, out_dim). MXU matmul, f32 accumulation, f32 bias.
    h = jnp.dot(x, w1_ref[...], preferred_element_type=jnp.float32) + b1_ref[...]

    # fc[1]: ReLU (VPU, hidden under the MXU).
    h = jnp.maximum(h, 0.0)

    # fc[2]: Linear(out_dim, out_dim).
    y = jnp.dot(h.astype(compute_dtype), w2_ref[...],
                preferred_element_type=jnp.float32) + b2_ref[...]
    o_ref[...] = y.astype(o_ref.dtype)


def _pick_batch_tile(batch, block_b):
    """Pick the batch tile.

    Rules:
      * never larger than block_b (VMEM budget knob),
      * multiple of 8 (sublane constraint) unless it equals the full batch,
      * at least 2 roughly-even grid steps when the batch is big enough, so a
        "parallel" grid axis actually feeds both TensorCores on v7x.
    """
    tb = min(block_b, batch)
    if tb >= batch:
        if batch >= 16:
            tb = -(-batch // 2)          # ceil(batch / 2): two even-ish tiles
            tb = -(-tb // 8) * 8         # round up to a sublane multiple
            return min(tb, batch)
        return batch                     # tiny batch: single full-extent tile
    return max(8, (tb // 8) * 8)


def signature_embed(sig, w1, b1, w2, b2, *, block_b=8192,
                    compute_dtype=jnp.float32, out_dtype=jnp.float32,
                    vmem_limit_bytes=None):
    """Forward pass of SignatureEmbed.

    sig : (B, max_cells)  any float/int dtype (upcast in-kernel, like sig.float())
    w1  : (max_cells, out_dim) f32, b1 : (out_dim,) or (1, out_dim) f32
    w2  : (out_dim, out_dim)   f32, b2 : (out_dim,) or (1, out_dim) f32
    returns (B, out_dim) in out_dtype (default float32, matching the module)
    """
    B, max_cells = sig.shape
    out_dim = w2.shape[1]
    b1 = b1.reshape(1, out_dim).astype(jnp.float32)
    b2 = b2.reshape(1, out_dim).astype(jnp.float32)
    # Pre-cast the VMEM-resident weights once here instead of every grid step
    # inside the kernel (also halves the one-time weight DMA when bf16).
    w1 = w1.astype(compute_dtype)
    w2 = w2.astype(compute_dtype)

    tb = _pick_batch_tile(B, block_b)
    grid = (pl.cdiv(B, tb),)

    kernel = functools.partial(_signature_embed_kernel,
                               compute_dtype=compute_dtype)

    flops = 2 * B * (max_cells + out_dim) * out_dim
    bytes_accessed = (
        sig.size * sig.dtype.itemsize
        + w1.size * w1.dtype.itemsize + w2.size * w2.dtype.itemsize
        + (b1.size + b2.size) * 4
        + B * out_dim * jnp.dtype(out_dtype).itemsize
    )

    return pl.pallas_call(
        kernel,
        out_shape=jax.ShapeDtypeStruct((B, out_dim), out_dtype),
        grid=grid,
        in_specs=[
            # Activations stream over the batch axis.
            pl.BlockSpec((tb, max_cells), lambda i: (i, 0)),
            # Weights/biases: constant block index -> fetched once, stay
            # VMEM-resident for every grid step.
            pl.BlockSpec((max_cells, out_dim), lambda i: (0, 0)),
            pl.BlockSpec((1, out_dim), lambda i: (0, 0)),
            pl.BlockSpec((out_dim, out_dim), lambda i: (0, 0)),
            pl.BlockSpec((1, out_dim), lambda i: (0, 0)),
        ],
        out_specs=pl.BlockSpec((tb, out_dim), lambda i: (i, 0)),
        compiler_params=pltpu.CompilerParams(
            # Batch tiles are independent: shards across both TensorCores on
            # v7x; neutral on v5e/v6e (1 TC).
            dimension_semantics=("parallel",),
            vmem_limit_bytes=vmem_limit_bytes,
        ),
        cost_estimate=pl.CostEstimate(
            flops=flops, transcendentals=0, bytes_accessed=bytes_accessed),
    )(sig, w1, b1, w2, b2)


def _reference_f32(sig, w1, b1, w2, b2):
    # Exact f32 math matching the PyTorch module (HIGHEST so the XLA reference
    # matmul uses full-precision passes like the in-kernel f32 matmul).
    x = sig.astype(jnp.float32)
    h = jnp.maximum(
        jnp.dot(x, w1, precision=jax.lax.Precision.HIGHEST) + b1.reshape(1, -1),
        0.0)
    return (jnp.dot(h, w2, precision=jax.lax.Precision.HIGHEST)
            + b2.reshape(1, -1))


if __name__ == "__main__":
    key = jax.random.PRNGKey(0)
    k_sig, k_w1, k_b1, k_w2, k_b2 = jax.random.split(key, 5)

    batch = 256
    max_cells = 32
    out_dim = 64

    # Signature matrix: tiny integer counts, stored int8 so the HBM read is
    # compact; the kernel performs the sig.float() upcast in VMEM.
    sig = jax.random.randint(
        k_sig, (batch, max_cells), 0, 3, dtype=jnp.int32).astype(jnp.int8)

    # Deterministic parameter init (mimicking nn.Linear's uniform init scale).
    lim1 = 1.0 / jnp.sqrt(max_cells)
    lim2 = 1.0 / jnp.sqrt(out_dim)
    w1 = jax.random.uniform(k_w1, (max_cells, out_dim), jnp.float32, -lim1, lim1)
    b1 = jax.random.uniform(k_b1, (out_dim,), jnp.float32, -lim1, lim1)
    w2 = jax.random.uniform(k_w2, (out_dim, out_dim), jnp.float32, -lim2, lim2)
    b2 = jax.random.uniform(k_b2, (out_dim,), jnp.float32, -lim2, lim2)

    # Default block_b; batch=256 -> tile picker yields tb=128, i.e. a 2-step
    # parallel grid (exercises multi-step pipelining and v7x 2-TC sharding).
    out = signature_embed(sig, w1, b1, w2, b2)
    out = jax.block_until_ready(out)

    assert out.shape == (batch, out_dim)
    assert out.dtype == jnp.float32

    ref = _reference_f32(sig, w1, b1, w2, b2)
    max_err = float(jnp.max(jnp.abs(out - ref)))
    assert jnp.allclose(out, ref, atol=2e-3, rtol=2e-3), max_err

    print("KERNEL_OK")
</pallas_src>

<mosaic_0001>
module attributes {stable_mosaic.version = 11 : i64} {
  func.func @_signature_embed_kernel(%arg0: i32, %arg1: memref<128x32xi8, #tpu.memory_space<vmem>>, %arg2: memref<32x64xf32, #tpu.memory_space<vmem>>, %arg3: memref<1x64xf32, #tpu.memory_space<vmem>>, %arg4: memref<64x64xf32, #tpu.memory_space<vmem>>, %arg5: memref<1x64xf32, #tpu.memory_space<vmem>>, %arg6: memref<128x64xf32, #tpu.memory_space<vmem>>) attributes {dimension_semantics = [#tpu.dimension_semantics<parallel>], iteration_bounds = array<i64: 2>, scalar_prefetch = 0 : i64, scratch_operands = 0 : i64, tpu.core_type = #tpu.core_type<tc>, window_params = [{transform_indices = @transform_0, window_bounds = array<i64: 128, 32>}, {pipeline_mode = #tpu.pipeline_mode<synchronous>, transform_indices = @transform_1, window_bounds = array<i64: 32, 64>}, {pipeline_mode = #tpu.pipeline_mode<synchronous>, transform_indices = @transform_2, window_bounds = array<i64: 1, 64>}, {pipeline_mode = #tpu.pipeline_mode<synchronous>, transform_indices = @transform_3, window_bounds = array<i64: 64, 64>}, {pipeline_mode = #tpu.pipeline_mode<synchronous>, transform_indices = @transform_4, window_bounds = array<i64: 1, 64>}, {transform_indices = @transform_5, window_bounds = array<i64: 128, 64>}]} {
    %c0 = arith.constant 0 : index
    %c0_0 = arith.constant 0 : index
    %0 = vector.load %arg1[%c0, %c0_0] : memref<128x32xi8, #tpu.memory_space<vmem>>, vector<128x32xi8>
    %1 = arith.sitofp %0 : vector<128x32xi8> to vector<128x32xf32>
    %c0_1 = arith.constant 0 : index
    %c0_2 = arith.constant 0 : index
    %2 = vector.load %arg2[%c0_1, %c0_2] : memref<32x64xf32, #tpu.memory_space<vmem>>, vector<32x64xf32>
    %cst = arith.constant dense<0.000000e+00> : vector<128x64xf32>
    %3 = tpu.matmul %1, %2, %cst {dimension_numbers = #tpu.dot_dimension_numbers<[1], [0], [0], [1], [0, 0, 1, 1], [], []>} : vector<128x32xf32>, vector<32x64xf32>, vector<128x64xf32> -> vector<128x64xf32>
    %c0_3 = arith.constant 0 : index
    %c0_4 = arith.constant 0 : index
    %4 = vector.load %arg3[%c0_3, %c0_4] : memref<1x64xf32, #tpu.memory_space<vmem>>, vector<1x64xf32>
    %5 = vector.broadcast %4 : vector<1x64xf32> to vector<128x64xf32>
    %6 = arith.addf %3, %5 : vector<128x64xf32>
    %cst_5 = arith.constant 0.000000e+00 : f32
    %7 = vector.broadcast %cst_5 : f32 to vector<128x64xf32>
    %8 = arith.maximumf %6, %7 : vector<128x64xf32>
    %c0_6 = arith.constant 0 : index
    %c0_7 = arith.constant 0 : index
    %9 = vector.load %arg4[%c0_6, %c0_7] : memref<64x64xf32, #tpu.memory_space<vmem>>, vector<64x64xf32>
    %cst_8 = arith.constant dense<0.000000e+00> : vector<128x64xf32>
    %10 = tpu.matmul %8, %9, %cst_8 {dimension_numbers = #tpu.dot_dimension_numbers<[1], [0], [0], [1], [0, 0, 1, 1], [], []>} : vector<128x64xf32>, vector<64x64xf32>, vector<128x64xf32> -> vector<128x64xf32>
    %c0_9 = arith.constant 0 : index
    %c0_10 = arith.constant 0 : index
    %11 = vector.load %arg5[%c0_9, %c0_10] : memref<1x64xf32, #tpu.memory_space<vmem>>, vector<1x64xf32>
    %12 = vector.broadcast %11 : vector<1x64xf32> to vector<128x64xf32>
    %13 = arith.addf %10, %12 : vector<128x64xf32>
    %c0_11 = arith.constant 0 : index
    %c0_12 = arith.constant 0 : index
    %14 = vector.load %arg6[%c0_11, %c0_12] : memref<128x64xf32, #tpu.memory_space<vmem>>, vector<128x64xf32>
    tpu.vector_store %arg6[%c0_11, %c0_12], %13 {strides = array<i32>} : memref<128x64xf32, #tpu.memory_space<vmem>>, vector<128x64xf32>,
    return
  }
  func.func @transform_0(%arg0: i32) -> (i32, i32) {
    %c0_i32 = arith.constant 0 : i32
    %c0_i32_0 = arith.constant 0 : i32
    return %arg0, %c0_i32 : i32, i32
  }
  func.func @transform_1(%arg0: i32) -> (i32, i32) {
    %c0_i32 = arith.constant 0 : i32
    %c0_i32_0 = arith.constant 0 : i32
    %c0_i32_1 = arith.constant 0 : i32
    return %c0_i32, %c0_i32_0 : i32, i32
  }
  func.func @transform_2(%arg0: i32) -> (i32, i32) {
    %c0_i32 = arith.constant 0 : i32
    %c0_i32_0 = arith.constant 0 : i32
    %c0_i32_1 = arith.constant 0 : i32
    return %c0_i32, %c0_i32_0 : i32, i32
  }
  func.func @transform_3(%arg0: i32) -> (i32, i32) {
    %c0_i32 = arith.constant 0 : i32
    %c0_i32_0 = arith.constant 0 : i32
    %c0_i32_1 = arith.constant 0 : i32
    return %c0_i32, %c0_i32_0 : i32, i32
  }
  func.func @transform_4(%arg0: i32) -> (i32, i32) {
    %c0_i32 = arith.constant 0 : i32
    %c0_i32_0 = arith.constant 0 : i32
    %c0_i32_1 = arith.constant 0 : i32
    return %c0_i32, %c0_i32_0 : i32, i32
  }
  func.func @transform_5(%arg0: i32) -> (i32, i32) {
    %c0_i32 = arith.constant 0 : i32
    %c0_i32_0 = arith.constant 0 : i32
    return %arg0, %c0_i32 : i32, i32
  }
}

</mosaic_0001>

<bundles_post_ra>
// kernel: tpu_custom_call.1
= control target key start
LH: loop header
LB: loop body
LE: loop exit
PB: predicated region body
PF: predicated region fallthrough
CT: control target
= control target key end

     0   :  { %10 = vsyncpa [#allocation3], 0  ;;  %s1082_s18 = smov 0   ;;  %s1240_s0 = inlined_call_operand.vmem [shape: s8[256,32], index: 0, kind: input, shape index: {}]   ;;  %s1241_s1 = inlined_call_operand.hbm [shape: f32[32,64], index: 1, kind: input, shape index: {}]   ;;  %s1242_s2 = inlined_call_operand.vmem [shape: f32[1,64], index: 2, kind: input, shape index: {}]   ;;  %s1243_s3 = inlined_call_operand.vmem [shape: f32[64,64], index: 3, kind: input, shape index: {}]   ;;  %s1244_s4 = inlined_call_operand.vmem [shape: f32[1,64], index: 4, kind: input, shape index: {}]   ;;  %s1245_s5 = inlined_call_operand.vmem [shape: f32[256,64], index: 5, kind: output, shape index: {}]  }
   0x1 LB: > { %s1088_s19 = sadd.s32 4294967295, %s1047_s18   ;;  %p795_p0 = scmp.ge.s32.totalorder %s1047_s18, 1  ;;  %s1047_s18 = sphi %s1082_s18, %s16_s18  }
   0x2   : > { %p157_p1 = scmp.lt.s32.totalorder %s1047_s18, 3  ;;  %s1049_s20 = smov [#allocation2]  }
   0x3   : > { %s169_s21 = sshll.u32 %s1049_s20, 4  ;;  %p1246_p3 = scmp.eq.s32.totalorder %s1088_s19, 0  ;;  %s170_s21 = int_to_ptr.vmem [resolvable:$true] %s169_s21 }
   0x4   : > { %p1092_p2 = pnand %p795_p0, %p157_p1  ;;  %s1009_s26 = scalar_lea.hbm %s1241_s1, 512 }
   0x5   : > { %p1010_p6 = scmp.ne.s32.totalorder %s1241_s1, %s1009_s26  ;;  %p1016_p10 = scmp.lt.u32.totalorder %s1009_s26, %s1241_s1 }
   0x6   : > { %s1248_s22 = scalar_select %p1092_p2, 1, 0 }
   0x7   : > { %p992_p4 = pneg %p1092_p2 }
   0x9   : > { %p1101_p5 = pnand %p1246_p3, %p992_p4 }
   0xb   : > { %p1011_p7 = pneg %p1101_p5 }
   0xd   : > { %p1012_p8 = pnand %p1011_p7, %p1010_p6 }
   0xf   : > { %p1013_p9 = pneg %p1012_p8 }
  0x11   : > { %p1018_p11 = pnand %p1016_p10, %p1013_p9 }
  0x13   : > { %1021 = shalt.err (!%p1018_p11)
}
  0x14   : > { %s1022_s6 = scalar_lea.vmem %s170_s21, 512  ;;  %p1030_p1 = scmp.lt.s32.totalorder %s170_s21, %s170_s21 }
  0x15   : > { %p1023_p12 = scmp.ne.s32.totalorder %s170_s21, %s1022_s6  ;;  %p1031_p4 = scmp.lt.s32.totalorder %s1022_s6, %s1022_s6 }
  0x17   : > { %p1025_p13 = pnand %p1023_p12, %p1011_p7  ;;  %p1032_p3 = por %p1031_p4, %p1030_p1 }
  0x19   : > { %p1026_p0 = pneg %p1025_p13 }
  0x1b   : > { %p1033_p2 = pnand %p1032_p3, %p1026_p0 }
  0x1d   : > { %1036 = shalt.err (!%p1033_p2)
}
  0x1e   : > { %s1050_s7 = smov 128   ;;  %s1051_s8 = smov 8  }
  0x1f   : > { %995 = dma.hbm_to_vmem [thread:$0]  (!%p1101_p5), %s1241_s1, 512, %s170_s21, [#allocation3], %s1050_s7, %s1050_s7, %s1051_s8  }
  0x20   : > { %p1250_p6 = scmp.ne.s32.totalorder %s1248_s22, 0 }
  0x21   : > { %p1251_p8 = scmp.eq.s32.totalorder (!%p1250_p6), %s1088_s19, 0 }
  0x22   : > { %203 = sbr.rel (%p1250_p6) target bundleno = 516 (0x204), region = 40 }
  0x29   : > { %1042 = dma.done.wait (%p1251_p8), [#allocation3], 512   ;;  %p1252_p7 = pmov %p1251_p8 }
  0x2a   : > { %s800_s11 = sshll.u32 %s1088_s19, 2  ;;  %v279_v0 = vld [vmem:[#allocation2] sm:$0xff]  ;;  %v280_v1 = vld [vmem:[#allocation2 + $0x8] sm:$0xff]  ;;  %v281_v2 = vld [vmem:[#allocation2 + $0x10] sm:$0xff]  ;;  %vm290_vm0 = vcmask 261120   ;;  %vm515_vm1 = vcmask 523264  }
  0x2b   : > { %1044 = vsyncadd (%p1252_p7), [#allocation3], 4294966784  ;;  %p232_p2 = scmp.lt.s32.totalorder %s800_s11, 7  ;;  %v956_v3 = vpack.c.bf16 %v280_v1, %v279_v0  ;;  %v282_v4 = vld [vmem:[#allocation2 + $0x18] sm:$0xff]  ;;  %v500_v12 = vld [vmem:[%s1243_s3] sm:$0xff] }
  0x2c   : > { %v960_v6 = vpack.c.bf16 %v282_v4, %v281_v2  ;;  %v501_v15 = vld [vmem:[%s1243_s3 + $0x8] sm:$0xff]  ;;  %v502_v16 = vld [vmem:[%s1243_s3 + $0x10] sm:$0xff]  ;;  %v503_v17 = vld [vmem:[%s1243_s3 + $0x18] sm:$0xff] }
  0x2d   : > { %s1254_s11 = smov (!%p232_p2, %s800_s11), 7  ;;  %957 = vmatprep.subr.bf16.mxu0 %v956_v3  ;;  %v964_v20 = vpack.c.bf16 %v501_v15, %v500_v12  ;;  %v968_v21 = vpack.c.bf16 %v503_v17, %v502_v16  ;;  %v504_v24 = vld [vmem:[%s1243_s3 + $0x20] sm:$0xff]  ;;  %v505_v25 = vld [vmem:[%s1243_s3 + $0x28] sm:$0xff]  ;;  %v506_v51 = vld [vmem:[%s1243_s3 + $0x30] sm:$0xff] }
  0x2e   : > { %s801_s12 = sshll.u32 %s1254_s11, 3  ;;  %959 = vmatpush3.bf16.msra.mxu0 %v956_v3  ;;  %v972_v29 = vpack.c.bf16 %v505_v25, %v504_v24  ;;  %v507_v52 = vld [vmem:[%s1243_s3 + $0x38] sm:$0xff]  ;;  %v804_v54 = vld [vmem:[%s1242_s2] ss:$0 sm:$0xff]  ;;  %s802_s11 = sshll.u32 %s1088_s19, 4 }
  0x2f   : > { %s1131_s15 = scalar_lea.vmem %s1240_s0, %s801_s12  ;;  %961 = vmatprep.subr.bf16.mxu0 %v960_v6  ;;  %980 = vmatprep.subr.bf16.mxu1 %v964_v20  ;;  %v976_v53 = vpack.c.bf16 %v507_v52, %v506_v51  ;;  %p238_p3 = scmp.lt.s32.totalorder %s802_s11, 31 }
  0x30   : > { %v243_v5 = vld [vmem:[%s1131_s15] sm:$0xff]  ;;  %v244_v11 = vld [vmem:[%s1131_s15 + $0x8] sm:$0xff]  ;;  %v245_v28 = vld [vmem:[%s1131_s15 + $0x10] sm:$0xff]  ;;  %984 = vmatpush3.bf16.msra.mxu1 %v964_v20 }
  0x31   : > { %v247_v7 = vunpack.c.0.s8 %v243_v5  ;;  %v248_v8 = vunpack.c.1.s8 %v243_v5  ;;  %v249_v10 = vunpack.c.2.s8 %v243_v5  ;;  %v250_v14 = vunpack.c.3.s8 %v243_v5  ;;  %981 = vmatprep.subr.bf16.mxu1 %v968_v21  ;;  %v246_v38 = vld [vmem:[%s1131_s15 + $0x18] sm:$0xff]  ;;  %s1256_s11 = smov (!%p238_p3, %s802_s11), 31 }
  0x32   : > { %963 = vmatpush3.bf16.msra.mxu0 %v960_v6  ;;  %v251_v19 = vunpack.c.0.s8 %v244_v11  ;;  %v252_v23 = vunpack.c.1.s8 %v244_v11  ;;  %v253_v27 = vunpack.c.2.s8 %v244_v11  ;;  %v254_v31 = vunpack.c.3.s8 %v244_v11  ;;  %s803_s12 = sshll.u32 %s1256_s11, 3 }
  0x33   : > { %v263_v9 = vcvt.s32.f32 %v247_v7  ;;  %v264_v13 = vcvt.s32.f32 %v248_v8  ;;  %v265_v18 = vcvt.s32.f32 %v249_v10  ;;  %v266_v22 = vcvt.s32.f32 %v250_v14  ;;  %965 = vmatprep.subr.bf16.mxu0 %v964_v20  ;;  %s1203_s17 = scalar_lea.vmem %s1245_s5, %s803_s12 }
  0x34   : > { %v267_v26 = vcvt.s32.f32 %v251_v19  ;;  %v268_v30 = vcvt.s32.f32 %v252_v23  ;;  %v269_v32 = vcvt.s32.f32 %v253_v27  ;;  %v255_v33 = vunpack.c.0.s8 %v245_v28  ;;  %985 = vmatpush3.bf16.msra.mxu1 %v968_v21 }
  0x35   : > { %892 = vmatprep.mubr.msk.f32.mxu0 %vm290_vm0, %v263_v9  ;;  %v270_v34 = vcvt.s32.f32 %v254_v31  ;;  %v256_v35 = vunpack.c.1.s8 %v245_v28  ;;  %982 = vmatprep.subr.bf16.mxu1 %v972_v29  ;;  %v257_v37 = vunpack.c.2.s8 %v245_v28  ;;  %v258_v40 = vunpack.c.3.s8 %v245_v28 }
  0x36   : > { %893 = vmatmul.mubr.msk.f32.vlgmr.msra.gmra.mrb[0].mxu0 %vm290_vm0, %v264_v13  ;;  %v271_v36 = vcvt.s32.f32 %v255_v33  ;;  %v259_v42 = vunpack.c.0.s8 %v246_v38  ;;  %v260_v44 = vunpack.c.1.s8 %v246_v38  ;;  %v261_v46 = vunpack.c.2.s8 %v246_v38 }
  0x37   : > { %895 = vmatprep.mubr.msk.f32.mxu0 %vm290_vm0, %v265_v18  ;;  %967 = vmatpush3.bf16.msra.mxu0 %v964_v20  ;;  %v272_v39 = vcvt.s32.f32 %v256_v35  ;;  %v273_v41 = vcvt.s32.f32 %v257_v37  ;;  %v274_v43 = vcvt.s32.f32 %v258_v40  ;;  %v262_v48 = vunpack.c.3.s8 %v246_v38 }
  0x38   : > { %969 = vmatprep.subr.bf16.mxu0 %v968_v21  ;;  %986 = vmatpush3.bf16.msra.mxu1 %v972_v29  ;;  %v275_v45 = vcvt.s32.f32 %v259_v42  ;;  %v276_v47 = vcvt.s32.f32 %v260_v44  ;;  %v277_v49 = vcvt.s32.f32 %v261_v46 }
  0x39   : > { %v278_v50 = vcvt.s32.f32 %v262_v48  ;;  %983 = vmatprep.subr.bf16.mxu1 %v976_v53 }
  0x3a   : > { %896 = vmatmul.mubr.msk.f32.gmra.mrb[2].mxu0 %vm290_vm0, %v266_v22 }
  0x3b   : > { %898 = vmatprep.mubr.msk.f32.mxu0 %vm290_vm0, %v267_v26  ;;  %971 = vmatpush3.bf16.msra.mxu0 %v968_v21 }
  0x3c   : > { %973 = vmatprep.subr.bf16.mxu0 %v972_v29  ;;  %987 = vmatpush3.bf16.msra.mxu1 %v976_v53 }
  0x3e   : > { %899 = vmatmul.mubr.msk.f32.gmra.mrb[4].mxu0 %vm290_vm0, %v268_v30 }
  0x3f   : > { %901 = vmatprep.mubr.msk.f32.mxu0 %vm290_vm0, %v269_v32  ;;  %975 = vmatpush3.bf16.msra.mxu0 %v972_v29 }
  0x40   : > { %977 = vmatprep.subr.bf16.mxu0 %v976_v53 }
  0x42   : > { %902 = vmatmul.mubr.msk.f32.gmra.mrb[6].mxu0 %vm290_vm0, %v270_v34 }
  0x43   : > { %904 = vmatprep.mubr.msk.f32.mxu0 %vm290_vm0, %v271_v36  ;;  %979 = vmatpush3.bf16.msra.mxu0 %v976_v53 }
  0x46   : > { %905 = vmatmul.mubr.msk.f32.gmra.mrb[8].mxu0 %vm290_vm0, %v272_v39  ;;  %v821_v39 = vld [vmem:[%s1244_s4] ss:$0 sm:$0xff] }
  0x47   : > { %907 = vmatprep.mubr.msk.f32.mxu0 %vm290_vm0, %v273_v41 }
  0x4a   : > { %908 = vmatmul.mubr.msk.f32.gmra.mrb[10].mxu0 %vm290_vm0, %v274_v43 }
  0x4b   : > { %910 = vmatprep.mubr.msk.f32.mxu0 %vm290_vm0, %v275_v45 }
  0x4e   : > { %911 = vmatmul.mubr.msk.f32.gmra.mrb[12].mxu0 %vm290_vm0, %v276_v47 }
  0x4f   : > { %913 = vmatprep.mubr.msk.f32.mxu0 %vm290_vm0, %v277_v49 }
  0x52   : > { %914 = vmatmul.mubr.msk.f32.gmra.mrb[14].mxu0 %vm290_vm0, %v278_v50 }
 0x109   : > { %v894_v55 = vpop.f32.mrb[0].mxu0 }
 0x10a   : > { %v411_v56 = vadd.f32 %v894_v55, %v804_v54  ;;  %v405_v57 = vpop.f32.mrb[1].mxu0 }
 0x10b   : > { %v406_v58 = vadd.f32 %v804_v54, %v405_v57 }
 0x10c   : > { %v485_v61 = vmax.f32 %v411_v56, 0.0 }
 0x10d   : > { %v484_v59 = vmax.f32 %v406_v58, 0.0  ;;  %v897_v60 = vpop.f32.mrb[2].mxu0 }
 0x10e   : > { %v421_v62 = vadd.f32 %v897_v60, %v804_v54  ;;  %v415_v63 = vpop.f32.mrb[3].mxu0 }
 0x10f   : > { %v416_v0 = vadd.f32 %v804_v54, %v415_v63  ;;  %932 = vmatprep.mubr.msk.f32.mxu0 %vm515_vm1, %v484_v59 }
 0x110   : > { %933 = vmatmul.mubr.msk.f32.vlgmr.msra.gmra.mrb[16].mxu0 %vm515_vm1, %v485_v61  ;;  %v487_v3 = vmax.f32 %v421_v62, 0.0 }
 0x111   : > { %v486_v1 = vmax.f32 %v416_v0, 0.0  ;;  %v900_v2 = vpop.f32.mrb[4].mxu0 }
 0x112   : > { %v431_v4 = vadd.f32 %v900_v2, %v804_v54  ;;  %v425_v5 = vpop.f32.mrb[5].mxu0 }
 0x113   : > { %v426_v6 = vadd.f32 %v804_v54, %v425_v5  ;;  %935 = vmatprep.mubr.msk.f32.mxu1 %vm515_vm1, %v486_v1 }
 0x114   : > { %936 = vmatmul.mubr.msk.f32.vlgmr.msra.gmra.mrb[0].mxu1 %vm515_vm1, %v487_v3  ;;  %v489_v9 = vmax.f32 %v431_v4, 0.0 }
 0x115   : > { %v488_v7 = vmax.f32 %v426_v6, 0.0  ;;  %v903_v8 = vpop.f32.mrb[6].mxu0 }
 0x116   : > { %v441_v10 = vadd.f32 %v903_v8, %v804_v54  ;;  %v435_v11 = vpop.f32.mrb[7].mxu0 }
 0x117   : > { %v436_v12 = vadd.f32 %v804_v54, %v435_v11  ;;  %938 = vmatprep.mubr.msk.f32.mxu1 %vm515_vm1, %v488_v7 }
 0x118   : > { %939 = vmatmul.mubr.msk.f32.gmra.mrb[2].mxu1 %vm515_vm1, %v489_v9  ;;  %v491_v15 = vmax.f32 %v441_v10, 0.0 }
 0x119   : > { %v490_v13 = vmax.f32 %v436_v12, 0.0  ;;  %v906_v14 = vpop.f32.mrb[8].mxu0 }
 0x11a   : > { %v451_v16 = vadd.f32 %v906_v14, %v804_v54  ;;  %v445_v17 = vpop.f32.mrb[9].mxu0 }
 0x11b   : > { %v446_v18 = vadd.f32 %v804_v54, %v445_v17  ;;  %941 = vmatprep.mubr.msk.f32.mxu1 %vm515_vm1, %v490_v13 }
 0x11c   : > { %942 = vmatmul.mubr.msk.f32.gmra.mrb[4].mxu1 %vm515_vm1, %v491_v15  ;;  %v493_v21 = vmax.f32 %v451_v16, 0.0 }
 0x11d   : > { %v492_v19 = vmax.f32 %v446_v18, 0.0  ;;  %v909_v20 = vpop.f32.mrb[10].mxu0 }
 0x11e   : > { %v461_v22 = vadd.f32 %v909_v20, %v804_v54  ;;  %v455_v23 = vpop.f32.mrb[11].mxu0 }
 0x11f   : > { %v456_v24 = vadd.f32 %v804_v54, %v455_v23  ;;  %944 = vmatprep.mubr.msk.f32.mxu1 %vm515_vm1, %v492_v19 }
 0x120   : > { %945 = vmatmul.mubr.msk.f32.gmra.mrb[6].mxu1 %vm515_vm1, %v493_v21  ;;  %v495_v27 = vmax.f32 %v461_v22, 0.0 }
 0x121   : > { %v494_v25 = vmax.f32 %v456_v24, 0.0  ;;  %v912_v26 = vpop.f32.mrb[12].mxu0 }
 0x122   : > { %v471_v28 = vadd.f32 %v912_v26, %v804_v54  ;;  %v465_v29 = vpop.f32.mrb[13].mxu0 }
 0x123   : > { %v466_v30 = vadd.f32 %v804_v54, %v465_v29  ;;  %947 = vmatprep.mubr.msk.f32.mxu1 %vm515_vm1, %v494_v25 }
 0x124   : > { %948 = vmatmul.mubr.msk.f32.gmra.mrb[8].mxu1 %vm515_vm1, %v495_v27  ;;  %v497_v33 = vmax.f32 %v471_v28, 0.0 }
 0x125   : > { %v496_v31 = vmax.f32 %v466_v30, 0.0  ;;  %v915_v32 = vpop.f32.mrb[14].mxu0 }
 0x126   : > { %v481_v34 = vadd.f32 %v915_v32, %v804_v54  ;;  %v475_v35 = vpop.f32.mrb[15].mxu0 }
 0x127   : > { %v476_v36 = vadd.f32 %v804_v54, %v475_v35  ;;  %950 = vmatprep.mubr.msk.f32.mxu1 %vm515_vm1, %v496_v31 }
 0x128   : > { %951 = vmatmul.mubr.msk.f32.gmra.mrb[10].mxu1 %vm515_vm1, %v497_v33  ;;  %v499_v38 = vmax.f32 %v481_v34, 0.0 }
 0x129   : > { %v498_v37 = vmax.f32 %v476_v36, 0.0 }
 0x12b   : > { %953 = vmatprep.mubr.msk.f32.mxu1 %vm515_vm1, %v498_v37 }
 0x12c   : > { %954 = vmatmul.mubr.msk.f32.gmra.mrb[12].mxu1 %vm515_vm1, %v499_v38 }
 0x1e3   : > { %v934_v40 = vpop.f32.mrb[16].mxu0 }
 0x1e4   : > { %v636_v41 = vadd.f32 %v934_v40, %v821_v39  ;;  %v630_v42 = vpop.f32.mrb[17].mxu0 }
 0x1e5   : > { %v631_v43 = vadd.f32 %v821_v39, %v630_v42 }
 0x1e6   : > { %710 = vst.msk [vmem:[%s1203_s17 + $0x8] sm:$0xff] %vm515_vm1, %v636_v41 }
 0x1e7   : > { %709 = vst.msk [vmem:[%s1203_s17] sm:$0xff] %vm515_vm1, %v631_v43  ;;  %v937_v44 = vpop.f32.mrb[0].mxu1 }
 0x1e8   : > { %v646_v45 = vadd.f32 %v937_v44, %v821_v39  ;;  %v640_v46 = vpop.f32.mrb[1].mxu1 }
 0x1e9   : > { %v641_v47 = vadd.f32 %v821_v39, %v640_v46 }
 0x1ea   : > { %712 = vst.msk [vmem:[%s1203_s17 + $0x18] sm:$0xff] %vm515_vm1, %v646_v45 }
 0x1eb   : > { %711 = vst.msk [vmem:[%s1203_s17 + $0x10] sm:$0xff] %vm515_vm1, %v641_v47  ;;  %v940_v48 = vpop.f32.mrb[2].mxu1 }
 0x1ec   : > { %v656_v49 = vadd.f32 %v940_v48, %v821_v39  ;;  %v650_v50 = vpop.f32.mrb[3].mxu1 }
 0x1ed   : > { %v651_v51 = vadd.f32 %v821_v39, %v650_v50 }
 0x1ee   : > { %714 = vst.msk [vmem:[%s1203_s17 + $0x28] sm:$0xff] %vm515_vm1, %v656_v49 }
 0x1ef   : > { %713 = vst.msk [vmem:[%s1203_s17 + $0x20] sm:$0xff] %vm515_vm1, %v651_v51  ;;  %v943_v52 = vpop.f32.mrb[4].mxu1 }
 0x1f0   : > { %v666_v53 = vadd.f32 %v943_v52, %v821_v39  ;;  %v660_v54 = vpop.f32.mrb[5].mxu1 }
 0x1f1   : > { %v661_v55 = vadd.f32 %v821_v39, %v660_v54 }
 0x1f2   : > { %716 = vst.msk [vmem:[%s1203_s17 + $0x38] sm:$0xff] %vm515_vm1, %v666_v53 }
 0x1f3   : > { %715 = vst.msk [vmem:[%s1203_s17 + $0x30] sm:$0xff] %vm515_vm1, %v661_v55  ;;  %v946_v56 = vpop.f32.mrb[6].mxu1 }
 0x1f4   : > { %v676_v57 = vadd.f32 %v946_v56, %v821_v39  ;;  %v670_v58 = vpop.f32.mrb[7].mxu1 }
 0x1f5   : > { %v671_v59 = vadd.f32 %v821_v39, %v670_v58 }
 0x1f6   : > { %718 = vst.msk [vmem:[%s1203_s17 + $0x48] sm:$0xff] %vm515_vm1, %v676_v57 }
 0x1f7   : > { %717 = vst.msk [vmem:[%s1203_s17 + $0x40] sm:$0xff] %vm515_vm1, %v671_v59  ;;  %v949_v60 = vpop.f32.mrb[8].mxu1 }
 0x1f8   : > { %v686_v61 = vadd.f32 %v949_v60, %v821_v39  ;;  %v680_v62 = vpop.f32.mrb[9].mxu1 }
 0x1f9   : > { %v681_v63 = vadd.f32 %v821_v39, %v680_v62 }
 0x1fa   : > { %720 = vst.msk [vmem:[%s1203_s17 + $0x58] sm:$0xff] %vm515_vm1, %v686_v61 }
 0x1fb   : > { %719 = vst.msk [vmem:[%s1203_s17 + $0x50] sm:$0xff] %vm515_vm1, %v681_v63  ;;  %v952_v0 = vpop.f32.mrb[10].mxu1 }
 0x1fc   : > { %v696_v1 = vadd.f32 %v952_v0, %v821_v39  ;;  %v690_v2 = vpop.f32.mrb[11].mxu1 }
 0x1fd   : > { %v691_v3 = vadd.f32 %v821_v39, %v690_v2 }
 0x1fe   : > { %722 = vst.msk [vmem:[%s1203_s17 + $0x68] sm:$0xff] %vm515_vm1, %v696_v1 }
 0x1ff   : > { %721 = vst.msk [vmem:[%s1203_s17 + $0x60] sm:$0xff] %vm515_vm1, %v691_v3  ;;  %v955_v4 = vpop.f32.mrb[12].mxu1 }
 0x200   : > { %v706_v5 = vadd.f32 %v955_v4, %v821_v39  ;;  %v700_v6 = vpop.f32.mrb[13].mxu1 }
 0x201   : > { %v701_v7 = vadd.f32 %v821_v39, %v700_v6 }
 0x202   : > { %724 = vst.msk [vmem:[%s1203_s17 + $0x78] sm:$0xff] %vm515_vm1, %v706_v5 }
 0x203   : > { %723 = vst.msk [vmem:[%s1203_s17 + $0x70] sm:$0xff] %vm515_vm1, %v701_v7 }
 0x204 PF: > { %s16_s18 = sadd.s32 1, %s1047_s18  }
 0x205   : > { %p13_p5 = scmp.ge.s32.totalorder %s16_s18, 4  }
 0x207   :  { %15 = sbr.rel (!%p13_p5) target bundleno = 1 (0x1), region = 75 }
 0x20e   :  { %747 = vsyncpa [#allocation3], 1 }
 0x20f   :  { %749 = vsyncpa [#allocation3 + $0x1], 1 }

</bundles_post_ra>
